<compile_context>
chip_gen: v7x
topology: tpu7x:2x2x1
jax: 0.10.0
libtpu: 0.0.40
codegen_flags: <defaults>
</compile_context>

<pallas_src>
import functools

import jax
import jax.numpy as jnp
from jax.experimental import pallas as pl
from jax.experimental.pallas import tpu as pltpu

LRELU_SLOPE = 0.01  # PyTorch nn.LeakyReLU default negative_slope


def _leaky_relu(h):
    # max(h, a*h): mul + max (2 VALU ops) vs cmp + mul + select (3 ops).
    # Numerically identical to the where-form for slope in (0, 1).
    return jnp.maximum(h, LRELU_SLOPE * h)


def _round_up(x, m):
    return m * pl.cdiv(x, m)


def mlp_kernel(x_ref, *refs):
    """Feature-major MLP forward.

    x_ref:   (din, TB)  streamed per grid step (f32 or bf16)
    refs:    alternating (W, b) refs for each Linear, PyTorch (out, in) layout,
             followed by the output ref (dout, TB).
             Layer-1 W/b and the final bias are f32; hidden weights carry the
             MXU input dtype, hidden biases carry the elementwise dtype.
    """
    o_ref = refs[-1]
    p_refs = refs[:-1]
    n_layers = len(p_refs) // 2

    w1_ref, b1_ref = p_refs[0], p_refs[1]
    mxu_dt = p_refs[2].dtype if n_layers > 1 else jnp.float32  # MXU input dtype
    act_dt = p_refs[3].dtype if n_layers > 1 else jnp.float32  # elementwise dtype

    # Layer 1: K = din (tiny, e.g. 2) -> VPU FMAs in f32, keep the MXU free.
    x = x_ref[...].astype(jnp.float32)            # (din, TB)
    w1 = w1_ref[...]                              # (nf, din) f32
    din = w1.shape[1]
    h = w1[:, 0:1] * x[0:1, :]
    for k in range(1, din):
        h = h + w1[:, k:k + 1] * x[k:k + 1, :]
    h = _leaky_relu(h + b1_ref[...])              # (nf, TB) f32

    # Hidden + final layers: (out, in) @ (in, TB) on the MXU, f32 accumulation.
    # Hidden bias-add / LeakyReLU run in act_dt (bf16 on v6e/v7x, f32 on v5e).
    for li in range(1, n_layers):
        w_ref, b_ref = p_refs[2 * li], p_refs[2 * li + 1]
        h = jnp.dot(w_ref[...], h.astype(mxu_dt),
                    preferred_element_type=jnp.float32)
        if li < n_layers - 1:
            h = _leaky_relu(h.astype(act_dt) + b_ref[...])
        else:
            h = h + b_ref[...]                    # final bias-add in f32

    o_ref[...] = h.astype(o_ref.dtype)            # lane-dense (dout, TB) store


@functools.partial(
    jax.jit,
    static_argnames=("block_b", "use_bf16", "bf16_elementwise",
                     "bf16_io", "feature_major_io"))
def mlp_forward(x, params, *, block_b=2048, use_bf16=True,
                bf16_elementwise=None, bf16_io=False, feature_major_io=False):
    """MLP forward.

    x: (B, din) f32, or (din, B) when feature_major_io=True (skips transposes).
    params: list of (W, b) per Linear; W (out, in), b (out, 1).
    Returns (B, dout), or (dout, B) when feature_major_io=True.
    use_bf16: bf16 MXU inputs (f32 accumulation).  bf16_elementwise: run the
    hidden bias/LeakyReLU chain in bf16 too (default = use_bf16; set False on
    v5e, which has no bf16 VALU).  bf16_io: stream x/out as bf16.
    """
    if bf16_elementwise is None:
        bf16_elementwise = use_bf16

    x_t = x if feature_major_io else x.T          # (din, B)
    din, B = x_t.shape
    n_layers = len(params)
    dout = params[-1][0].shape[0]
    nf = params[0][0].shape[0]

    io_dt = jnp.bfloat16 if bf16_io else jnp.float32
    x_t = x_t.astype(io_dt)

    # Batch tile: lane-aligned and as large as block_b allows (fewer fixed-cost
    # grid steps), but keep >= 2 grid steps so v7x's two TensorCores both get
    # work via dimension_semantics=("parallel",); the extra step is noise on
    # the single-core v5e/v6e.
    bp = _round_up(min(block_b, _round_up(B, 128)), 128)
    if B > 128:
        bp = min(bp, _round_up(pl.cdiv(B, 2), 128))
    grid = (pl.cdiv(B, bp),)   # ragged tail -> Pallas partial block (no jnp.pad)

    mxu_dt = jnp.bfloat16 if use_bf16 else jnp.float32
    act_dt = jnp.bfloat16 if (use_bf16 and bf16_elementwise) else jnp.float32

    flat_params = []
    for li, (w, b) in enumerate(params):
        w_dt = jnp.float32 if li == 0 else mxu_dt            # layer-1 on VPU
        b_dt = act_dt if (0 < li < n_layers - 1) else jnp.float32
        flat_params.extend([w.astype(w_dt), b.astype(b_dt)])

    # x/out stream over the grid; weights & biases stay VMEM-resident
    # (constant index_map => no per-step re-DMA).
    in_specs = [pl.BlockSpec((din, bp), lambda i: (0, i))]
    for a in flat_params:
        in_specs.append(pl.BlockSpec(a.shape, lambda i: (0, 0)))
    out_specs = pl.BlockSpec((dout, bp), lambda i: (0, i))

    # Scoped-VMEM headroom only matters for very large tiles (v5e default 16 MiB).
    act_bytes = 2 if (use_bf16 and bf16_elementwise) else 4
    vmem_est = (2 * bp * (din + dout) * x_t.dtype.itemsize    # 2x-buffered x/out
                + 6 * nf * bp * act_bytes                     # live activations
                + sum(a.size * a.dtype.itemsize for a in flat_params))
    ckwargs = dict(dimension_semantics=("parallel",))
    if vmem_est > 12 * 1024 * 1024:
        ckwargs["vmem_limit_bytes"] = min(2 * vmem_est, 48 * 1024 * 1024)

    out_t = pl.pallas_call(
        mlp_kernel,
        out_shape=jax.ShapeDtypeStruct((dout, B), io_dt),
        grid=grid,
        in_specs=in_specs,
        out_specs=out_specs,
        compiler_params=pltpu.CompilerParams(**ckwargs),
    )(x_t, *flat_params)

    return out_t if feature_major_io else out_t.T            # (B, dout)


def init_mlp_params(key, din=2, dout=10, num_filters=32, depth=3):
    """Synthetic params matching the PyTorch module (W in (out, in) layout)."""
    dims = [(din, num_filters)]
    for _ in range(depth - 1):
        dims.append((num_filters, num_filters))
    dims.append((num_filters, dout))

    params = []
    for (d_in, d_out) in dims:
        key, kw, _ = jax.random.split(key, 3)
        # Xavier-uniform (as in reset()/init_weights), bias = 0.01.
        limit = (6.0 / (d_in + d_out)) ** 0.5
        w = jax.random.uniform(kw, (d_out, d_in), jnp.float32, -limit, limit)
        b = jnp.full((d_out, 1), 0.01, dtype=jnp.float32)
        params.append((w, b))
    return params


def mlp_reference(x, params):
    """Plain-JAX reference (standard (B, features) layout)."""
    h = x
    for i, (w, b) in enumerate(params):
        h = h @ w.T + b[:, 0]
        if i < len(params) - 1:
            h = jnp.where(h >= 0, h, LRELU_SLOPE * h)
    return h


if __name__ == "__main__":
    key = jax.random.PRNGKey(0)
    din, dout, num_filters, depth = 2, 10, 32, 3
    B = 300  # not a multiple of the batch tile -> exercises the ragged last block

    kx, kp = jax.random.split(key)
    x = jax.random.normal(kx, (B, din), dtype=jnp.float32)
    params = init_mlp_params(kp, din=din, dout=dout,
                             num_filters=num_filters, depth=depth)
    ref = mlp_reference(x, params)

    # Default fast path: bf16 MXU inputs + bf16 elementwise, f32 accumulation.
    out = mlp_forward(x, params)
    jax.block_until_ready(out)
    assert out.shape == (B, dout)
    assert jnp.allclose(out, ref, atol=5e-2, rtol=5e-2)

    # Exact f32 path (bit-faithful to the PyTorch forward); also validates the
    # partial-last-block masking since B % bp != 0.
    out_f32 = mlp_forward(x, params, use_bf16=False)
    jax.block_until_ready(out_f32)
    assert out_f32.shape == (B, dout)
    assert jnp.allclose(out_f32, ref, atol=1e-4, rtol=1e-4)

    # Feature-major bf16 I/O path: no wrapper transposes, halved streamed bytes.
    out_fm = mlp_forward(x.T, params, bf16_io=True, feature_major_io=True)
    jax.block_until_ready(out_fm)
    assert out_fm.shape == (dout, B)
    assert jnp.allclose(out_fm.astype(jnp.float32).T, ref, atol=5e-2, rtol=5e-2)

    print("KERNEL_OK")
</pallas_src>

<mosaic_0001>
module attributes {stable_mosaic.version = 11 : i64} {
  func.func @mlp_kernel(%arg0: i32, %arg1: memref<2x256xf32, #tpu.memory_space<vmem>>, %arg2: memref<32x2xf32, #tpu.memory_space<vmem>>, %arg3: memref<32x1xf32, #tpu.memory_space<vmem>>, %arg4: memref<32x32xbf16, #tpu.memory_space<vmem>>, %arg5: memref<32x1xbf16, #tpu.memory_space<vmem>>, %arg6: memref<32x32xbf16, #tpu.memory_space<vmem>>, %arg7: memref<32x1xbf16, #tpu.memory_space<vmem>>, %arg8: memref<10x32xbf16, #tpu.memory_space<vmem>>, %arg9: memref<10x1xf32, #tpu.memory_space<vmem>>, %arg10: memref<10x256xf32, #tpu.memory_space<vmem>>) attributes {dimension_semantics = [#tpu.dimension_semantics<parallel>], iteration_bounds = array<i64: 2>, scalar_prefetch = 0 : i64, scratch_operands = 0 : i64, tpu.core_type = #tpu.core_type<tc>, window_params = [{transform_indices = @transform_0, window_bounds = array<i64: 2, 256>}, {pipeline_mode = #tpu.pipeline_mode<synchronous>, transform_indices = @transform_1, window_bounds = array<i64: 32, 2>}, {pipeline_mode = #tpu.pipeline_mode<synchronous>, transform_indices = @transform_2, window_bounds = array<i64: 32, 1>}, {pipeline_mode = #tpu.pipeline_mode<synchronous>, transform_indices = @transform_3, window_bounds = array<i64: 32, 32>}, {pipeline_mode = #tpu.pipeline_mode<synchronous>, transform_indices = @transform_4, window_bounds = array<i64: 32, 1>}, {pipeline_mode = #tpu.pipeline_mode<synchronous>, transform_indices = @transform_5, window_bounds = array<i64: 32, 32>}, {pipeline_mode = #tpu.pipeline_mode<synchronous>, transform_indices = @transform_6, window_bounds = array<i64: 32, 1>}, {pipeline_mode = #tpu.pipeline_mode<synchronous>, transform_indices = @transform_7, window_bounds = array<i64: 10, 32>}, {pipeline_mode = #tpu.pipeline_mode<synchronous>, transform_indices = @transform_8, window_bounds = array<i64: 10, 1>}, {transform_indices = @transform_9, window_bounds = array<i64: 10, 256>}]} {
    %c0 = arith.constant 0 : index
    %c0_0 = arith.constant 0 : index
    %0 = vector.load %arg1[%c0, %c0_0] : memref<2x256xf32, #tpu.memory_space<vmem>>, vector<2x256xf32>
    %c0_1 = arith.constant 0 : index
    %c0_2 = arith.constant 0 : index
    %1 = vector.load %arg2[%c0_1, %c0_2] : memref<32x2xf32, #tpu.memory_space<vmem>>, vector<32x2xf32>
    %2 = vector.extract_strided_slice %1 {offsets = [0, 0], sizes = [32, 1], strides = [1, 1]} : vector<32x2xf32> to vector<32x1xf32>
    %3 = vector.extract_strided_slice %0 {offsets = [0, 0], sizes = [1, 256], strides = [1, 1]} : vector<2x256xf32> to vector<1x256xf32>
    %4 = vector.broadcast %2 : vector<32x1xf32> to vector<32x256xf32>
    %5 = vector.broadcast %3 : vector<1x256xf32> to vector<32x256xf32>
    %6 = arith.mulf %4, %5 : vector<32x256xf32>
    %7 = vector.extract_strided_slice %1 {offsets = [0, 1], sizes = [32, 1], strides = [1, 1]} : vector<32x2xf32> to vector<32x1xf32>
    %8 = vector.extract_strided_slice %0 {offsets = [1, 0], sizes = [1, 256], strides = [1, 1]} : vector<2x256xf32> to vector<1x256xf32>
    %9 = vector.broadcast %7 : vector<32x1xf32> to vector<32x256xf32>
    %10 = vector.broadcast %8 : vector<1x256xf32> to vector<32x256xf32>
    %11 = arith.mulf %9, %10 : vector<32x256xf32>
    %12 = arith.addf %6, %11 : vector<32x256xf32>
    %c0_3 = arith.constant 0 : index
    %c0_4 = arith.constant 0 : index
    %13 = vector.load %arg3[%c0_3, %c0_4] : memref<32x1xf32, #tpu.memory_space<vmem>>, vector<32x1xf32>
    %14 = vector.broadcast %13 : vector<32x1xf32> to vector<32x256xf32>
    %15 = arith.addf %12, %14 : vector<32x256xf32>
    %cst = arith.constant 0.00999999977 : f32
    %16 = vector.broadcast %cst : f32 to vector<32x256xf32>
    %17 = arith.mulf %16, %15 : vector<32x256xf32>
    %18 = arith.maximumf %15, %17 : vector<32x256xf32>
    %c0_5 = arith.constant 0 : index
    %c0_6 = arith.constant 0 : index
    %19 = vector.load %arg4[%c0_5, %c0_6] : memref<32x32xbf16, #tpu.memory_space<vmem>>, vector<32x32xbf16>
    %20 = arith.truncf %18 : vector<32x256xf32> to vector<32x256xbf16>
    %cst_7 = arith.constant dense<0.000000e+00> : vector<32x256xf32>
    %21 = tpu.matmul %19, %20, %cst_7 {dimension_numbers = #tpu.dot_dimension_numbers<[1], [0], [0], [1], [0, 0, 1, 1], [], []>} : vector<32x32xbf16>, vector<32x256xbf16>, vector<32x256xf32> -> vector<32x256xf32>
    %22 = arith.truncf %21 : vector<32x256xf32> to vector<32x256xbf16>
    %c0_8 = arith.constant 0 : index
    %c0_9 = arith.constant 0 : index
    %23 = vector.load %arg5[%c0_8, %c0_9] : memref<32x1xbf16, #tpu.memory_space<vmem>>, vector<32x1xbf16>
    %24 = vector.broadcast %23 : vector<32x1xbf16> to vector<32x256xbf16>
    %25 = arith.addf %22, %24 : vector<32x256xbf16>
    %cst_10 = arith.constant 1.000980e-02 : bf16
    %26 = vector.broadcast %cst_10 : bf16 to vector<32x256xbf16>
    %27 = arith.mulf %26, %25 : vector<32x256xbf16>
    %28 = arith.maximumf %25, %27 : vector<32x256xbf16>
    %c0_11 = arith.constant 0 : index
    %c0_12 = arith.constant 0 : index
    %29 = vector.load %arg6[%c0_11, %c0_12] : memref<32x32xbf16, #tpu.memory_space<vmem>>, vector<32x32xbf16>
    %cst_13 = arith.constant dense<0.000000e+00> : vector<32x256xf32>
    %30 = tpu.matmul %29, %28, %cst_13 {dimension_numbers = #tpu.dot_dimension_numbers<[1], [0], [0], [1], [0, 0, 1, 1], [], []>} : vector<32x32xbf16>, vector<32x256xbf16>, vector<32x256xf32> -> vector<32x256xf32>
    %31 = arith.truncf %30 : vector<32x256xf32> to vector<32x256xbf16>
    %c0_14 = arith.constant 0 : index
    %c0_15 = arith.constant 0 : index
    %32 = vector.load %arg7[%c0_14, %c0_15] : memref<32x1xbf16, #tpu.memory_space<vmem>>, vector<32x1xbf16>
    %33 = vector.broadcast %32 : vector<32x1xbf16> to vector<32x256xbf16>
    %34 = arith.addf %31, %33 : vector<32x256xbf16>
    %cst_16 = arith.constant 1.000980e-02 : bf16
    %35 = vector.broadcast %cst_16 : bf16 to vector<32x256xbf16>
    %36 = arith.mulf %35, %34 : vector<32x256xbf16>
    %37 = arith.maximumf %34, %36 : vector<32x256xbf16>
    %c0_17 = arith.constant 0 : index
    %c0_18 = arith.constant 0 : index
    %38 = vector.load %arg8[%c0_17, %c0_18] : memref<10x32xbf16, #tpu.memory_space<vmem>>, vector<10x32xbf16>
    %cst_19 = arith.constant dense<0.000000e+00> : vector<10x256xf32>
    %39 = tpu.matmul %38, %37, %cst_19 {dimension_numbers = #tpu.dot_dimension_numbers<[1], [0], [0], [1], [0, 0, 1, 1], [], []>} : vector<10x32xbf16>, vector<32x256xbf16>, vector<10x256xf32> -> vector<10x256xf32>
    %c0_20 = arith.constant 0 : index
    %c0_21 = arith.constant 0 : index
    %40 = vector.load %arg9[%c0_20, %c0_21] : memref<10x1xf32, #tpu.memory_space<vmem>>, vector<10x1xf32>
    %41 = vector.broadcast %40 : vector<10x1xf32> to vector<10x256xf32>
    %42 = arith.addf %39, %41 : vector<10x256xf32>
    %c0_22 = arith.constant 0 : index
    %c0_23 = arith.constant 0 : index
    %43 = vector.load %arg10[%c0_22, %c0_23] : memref<10x256xf32, #tpu.memory_space<vmem>>, vector<10x256xf32>
    tpu.vector_store %arg10[%c0_22, %c0_23], %42 {strides = array<i32>} : memref<10x256xf32, #tpu.memory_space<vmem>>, vector<10x256xf32>,
    return
  }
  func.func @transform_0(%arg0: i32) -> (i32, i32) {
    %c0_i32 = arith.constant 0 : i32
    %c0_i32_0 = arith.constant 0 : i32
    return %c0_i32, %arg0 : i32, i32
  }
  func.func @transform_1(%arg0: i32) -> (i32, i32) {
    %c0_i32 = arith.constant 0 : i32
    %c0_i32_0 = arith.constant 0 : i32
    %c0_i32_1 = arith.constant 0 : i32
    return %c0_i32, %c0_i32_0 : i32, i32
  }
  func.func @transform_2(%arg0: i32) -> (i32, i32) {
    %c0_i32 = arith.constant 0 : i32
    %c0_i32_0 = arith.constant 0 : i32
    %c0_i32_1 = arith.constant 0 : i32
    return %c0_i32, %c0_i32_0 : i32, i32
  }
  func.func @transform_3(%arg0: i32) -> (i32, i32) {
    %c0_i32 = arith.constant 0 : i32
    %c0_i32_0 = arith.constant 0 : i32
    %c0_i32_1 = arith.constant 0 : i32
    return %c0_i32, %c0_i32_0 : i32, i32
  }
  func.func @transform_4(%arg0: i32) -> (i32, i32) {
    %c0_i32 = arith.constant 0 : i32
    %c0_i32_0 = arith.constant 0 : i32
    %c0_i32_1 = arith.constant 0 : i32
    return %c0_i32, %c0_i32_0 : i32, i32
  }
  func.func @transform_5(%arg0: i32) -> (i32, i32) {
    %c0_i32 = arith.constant 0 : i32
    %c0_i32_0 = arith.constant 0 : i32
    %c0_i32_1 = arith.constant 0 : i32
    return %c0_i32, %c0_i32_0 : i32, i32
  }
  func.func @transform_6(%arg0: i32) -> (i32, i32) {
    %c0_i32 = arith.constant 0 : i32
    %c0_i32_0 = arith.constant 0 : i32
    %c0_i32_1 = arith.constant 0 : i32
    return %c0_i32, %c0_i32_0 : i32, i32
  }
  func.func @transform_7(%arg0: i32) -> (i32, i32) {
    %c0_i32 = arith.constant 0 : i32
    %c0_i32_0 = arith.constant 0 : i32
    %c0_i32_1 = arith.constant 0 : i32
    return %c0_i32, %c0_i32_0 : i32, i32
  }
  func.func @transform_8(%arg0: i32) -> (i32, i32) {
    %c0_i32 = arith.constant 0 : i32
    %c0_i32_0 = arith.constant 0 : i32
    %c0_i32_1 = arith.constant 0 : i32
    return %c0_i32, %c0_i32_0 : i32, i32
  }
  func.func @transform_9(%arg0: i32) -> (i32, i32) {
    %c0_i32 = arith.constant 0 : i32
    %c0_i32_0 = arith.constant 0 : i32
    return %c0_i32, %arg0 : i32, i32
  }
}

</mosaic_0001>

<bundles_post_ra>
// kernel: mlp_forward.1
= control target key start
LH: loop header
LB: loop body
LE: loop exit
PB: predicated region body
PF: predicated region fallthrough
CT: control target
= control target key end

     0   :  { %14 = vsyncpa [#allocation3], 0  ;;  %s1403_s0 = inlined_call_operand.vmem [shape: f32[2,300], index: 0, kind: input, shape index: {}]   ;;  %s1404_s1 = inlined_call_operand.vmem [shape: f32[32,2], index: 1, kind: input, shape index: {}]   ;;  %s1405_s2 = inlined_call_operand.vmem [shape: f32[32,1], index: 2, kind: input, shape index: {}]   ;;  %s1406_s3 = inlined_call_operand.vmem [shape: bf16[32,32], index: 3, kind: input, shape index: {}]   ;;  %s1407_s4 = inlined_call_operand.vmem [shape: bf16[32,1], index: 4, kind: input, shape index: {}]   ;;  %s1408_s5 = inlined_call_operand.vmem [shape: bf16[32,32], index: 5, kind: input, shape index: {}]   ;;  %s1409_s6 = inlined_call_operand.vmem [shape: bf16[32,1], index: 6, kind: input, shape index: {}]   ;;  %s1410_s7 = inlined_call_operand.vmem [shape: bf16[10,32], index: 7, kind: input, shape index: {}]   ;;  %s1411_s8 = inlined_call_operand.vmem [shape: f32[10,1], index: 8, kind: input, shape index: {}]   ;;  %s1412_s9 = inlined_call_operand.hbm [shape: f32[10,300], index: 9, kind: output, shape index: {}]  }
   0x1   :  { %16 = vsyncpa [#allocation3 + $0x1], 0  ;;  %s1181_s30 = smov 0   ;;  %s1183_s10 = smov 0  }
   0x2   :  { %s1185_s11 = smov 0   ;;  %s1187_s12 = smov 0  }
   0x3 LB: > { %s1202_s13 = sadd.s32 4294967295, %s1123_s12   ;;  %s973_s14 = sadd.s32 4294967294, %s1123_s12   ;;  %s1123_s12 = sphi %s1187_s12, %s1418_s12   ;;  %s1119_s11 = sphi %s1185_s11, %s1417_s11   ;;  %s1115_s10 = sphi %s1183_s10, %s1416_s10   ;;  %s1111_s30 = sphi %s1181_s30, %s1415_s30  }
   0x4   : > { %s1206_s15 = sadd.s32 1, %s1123_s12   ;;  %s223_s16 = sadd.s32 1, %s1119_s11 }
   0x5   : > { %s220_s17 = ssub.s32 %s1123_s12, %s1206_s15  ;;  %p233_p0 = scmp.ne.s32.totalorder %s1119_s11, %s1115_s10 }
   0x6   : > { %p221_p1 = scmp.eq.s32.totalorder %s220_s17, 0  ;;  %p234_p2 = scmp.eq.s32.totalorder %s1202_s13, 1 }
   0x7   : > { %p239_p3 = scmp.ne.s32.totalorder %s1115_s10, %s1111_s30  ;;  %p240_p4 = scmp.eq.s32.totalorder %s973_s14, 1 }
   0x8   : > { %s1217_s18 = scalar_select %p221_p1, %s1119_s11, %s223_s16  }
   0x9   : > { %p1219_p5 = por %p234_p2, %p233_p0  ;;  %p1223_p6 = por %p240_p4, %p239_p3 }
   0xa   : > { %p976_p7 = scmp.ge.s32.totalorder %s1123_s12, 1  ;;  %p299_p8 = scmp.lt.s32.totalorder %s1123_s12, 3 }
   0xc   : > { %p300_p9 = pnand %p976_p7, %p299_p8 }
   0xd   : > { %v363_v0 = vld [vmem:[%s1404_s1 + $0x10] sm:$0xff] (!%p300_p9)  ;;  %v361_v1 = vld [vmem:[%s1404_s1] sm:$0xff] (!%p300_p9)  ;;  %v1125_v2 = vmov (!%p300_p9), 1   ;;  %v362_v3 = vld [vmem:[%s1404_s1 + $0x8] sm:$0xff] (!%p300_p9)  ;;  %v1126_v4 = vmov (!%p300_p9), 0   ;;  %s1289_s21 = sshll.u32 (!%p300_p9), %s1202_s13, 1  ;;  %v386_v20 = vlaneseq (!%p300_p9) }
   0xe   : > { %303 = sbr.rel (%p300_p9) target bundleno = 899 (0x383), region = 56  ;;  %1052 = vset.pattern.permute.xlu0 (!%p300_p9), %v1125_v2  ;;  %1050 = vset.pattern.permute.xlu1 (!%p300_p9), %v1125_v2  ;;  %v364_v5 = vld [vmem:[%s1404_s1 + $0x18] sm:$0xff] (!%p300_p9)  ;;  %v463_v6 = vld [vmem:[%s1405_s2 + $0x8] sm:$0xff] (!%p300_p9)  ;;  %v462_v7 = vld [vmem:[%s1405_s2] sm:$0xff] (!%p300_p9)  ;;  %p344_p10 = scmp.lt.s32.totalorder (!%p300_p9), %s1289_s21, 2  ;;  %vm528_vm0 = vcmask (!%p300_p9), 261120  }
   0xf   : > { %421 = vperm.xlu0 (!%p300_p9), %1052, %v363_v0   ;;  %413 = vperm.xlu1 (!%p300_p9), %1050, %v361_v1   ;;  %v592_v8 = vld [vmem:[%s1407_s4] sm:$0xf] (!%p300_p9)  ;;  %v464_v9 = vld [vmem:[%s1405_s2 + $0x10] sm:$0xff] (!%p300_p9)  ;;  %v594_v10 = vld [vmem:[%s1407_s4 + $0x8] sm:$0xf] (!%p300_p9)  ;;  %v1293_v21 = vshrl.u32 (!%p300_p9), %v386_v20, 7 }
  0x10   : > { %567 = vmatprep.mubr.bf16.mxu0 (!%p300_p9), %v1126_v4  ;;  %720 = vmatprep.mubr.bf16.mxu1 (!%p300_p9), %v1126_v4  ;;  %v465_v11 = vld [vmem:[%s1405_s2 + $0x18] sm:$0xff] (!%p300_p9)  ;;  %v745_v12 = vld [vmem:[%s1409_s6] sm:$0xf] (!%p300_p9)  ;;  %v593_v13 = vld [vmem:[%s1407_s4 + $0x4] sm:$0xf] (!%p300_p9) }
  0x11   : > { %v747_v14 = vld [vmem:[%s1409_s6 + $0x8] sm:$0xf] (!%p300_p9)  ;;  %v595_v15 = vld [vmem:[%s1407_s4 + $0xc] sm:$0xf] (!%p300_p9)  ;;  %v823_v16 = vld [vmem:[%s1411_s8] sm:$0xff] (!%p300_p9)  ;;  %v388_v24 = vsub.s32 (!%p300_p9), 0, %v1293_v21 }
  0x12   : > { %v746_v17 = vld [vmem:[%s1409_s6 + $0x4] sm:$0xf] (!%p300_p9)  ;;  %v748_v18 = vld [vmem:[%s1409_s6 + $0xc] sm:$0xf] (!%p300_p9)  ;;  %v824_v19 = vld [vmem:[%s1411_s8 + $0x8] sm:$0x3] (!%p300_p9) }
  0x13   : > { %1053 = vset.pattern.permute.xlu0 (!%p300_p9), %v1126_v4  ;;  %417 = vperm.xlu1 (!%p300_p9), %1050, %v362_v3   ;;  %v392_v25 = vsub.s32 (!%p300_p9), 2, %v1293_v21  ;;  %v430_v26 = vsub.s32 (!%p300_p9), 1, %v1293_v21  ;;  %v434_v27 = vsub.s32 (!%p300_p9), 3, %v1293_v21 }
  0x14   : > { %367 = vperm.xlu0 (!%p300_p9), %1053, %v361_v1  }
  0x15   : > { %s345_s22 = scalar_select %p344_p10, %s1289_s21, 2 }
  0x16   : > { %s899_s14 = ssub.s32 (%p1219_p5), 3, %s1289_s21 }
  0x17   : > { %1051 = vset.pattern.permute.xlu1 %v1126_v4  ;;  %s979_s23 = sshll.u32 %s345_s22, 1  ;;  %p900_p11 = scmp.lt.s32.totalorder (%p1219_p5), %s899_s14, 2 }
  0x18   : > { %372 = vperm.xlu0 %1053, %v362_v3   ;;  %382 = vperm.xlu1 %1051, %v364_v5   ;;  %s347_s26 = scalar_lea.vmem %s1403_s0, %s979_s23 }
  0x19   : > { %v360_v28 = vld [vmem:[%s347_s26] sm:$0xf]  ;;  %s336_s26 = sand.u32 1, %s1115_s10  }
  0x1a   : > { %v389_v31 = vrot.slane %v360_v28, %v388_v24  ;;  %v393_v32 = vrot.slane %v360_v28, %v392_v25  ;;  %v431_v33 = vrot.slane %v360_v28, %v430_v26  ;;  %v435_v34 = vrot.slane %v360_v28, %v434_v27  ;;  %s977_s27 = sshll.u32 %s336_s26, 5  ;;  %s1337_s29 = scalar_lea.sflag [#allocation3], %s336_s26 }
  0x1b   : > { %s338_s28 = scalar_lea.vmem [#allocation2], %s977_s27 }
  0x1c   : > { %377 = vperm.xlu0 %1053, %v363_v0   ;;  %1054 = vset.pattern.permute.xlu1 %v1125_v2  ;;  %v399_v35 = vrot.slane %v389_v31, %v388_v24  ;;  %v403_v36 = vrot.slane %v393_v32, %v388_v24  ;;  %v441_v39 = vrot.slane %v431_v33, %v430_v26 }
  0x1d   : > { %425 = vperm.xlu1 %1054, %v364_v5   ;;  %v445_v40 = vrot.slane %v435_v34, %v430_v26 }
  0x20   : > { %473 = vperm.xlu0 %1053, %v463_v6  }
  0x21   : > { %1055 = vset.pattern.permute.xlu1 %v1126_v4 }
  0x22   : > { %468 = vperm.xlu1 %1055, %v462_v7  }
  0x24   : > { %598 = vperm.xlu0 %1053, %v592_v8  }
  0x26   : > { %478 = vperm.xlu1 %1055, %v464_v9  }
  0x28   : > { %622 = vperm.xlu0 %1053, %v594_v10  }
  0x2a   : > { %483 = vperm.xlu1 %1055, %v465_v11  }
  0x2c   : > { %751 = vperm.xlu0 %1053, %v745_v12  }
  0x2e   : > { %610 = vperm.xlu1 %1055, %v593_v13  }
  0x30   : > { %775 = vperm.xlu0 %1053, %v747_v14  }
  0x32   : > { %634 = vperm.xlu1 %1055, %v595_v15  }
  0x34   : > { %827 = vperm.xlu0 %1053, %v823_v16  }
  0x36   : > { %763 = vperm.xlu1 %1055, %v746_v17  }
  0x3a   : > { %787 = vperm.xlu1 %1055, %v748_v18  }
  0x3e   : > { %832 = vperm.xlu1 %1055, %v824_v19  }
  0x8e   : > { %v414_v22 = vpop.permute.xlu1 %413  ;;  %v422_v23 = vpop.permute.xlu0 %421 }
  0x8f   : > { %v446_v49 = vmul.f32 %v441_v39, %v414_v22  ;;  %v447_v50 = vmul.f32 %v445_v40, %v414_v22  ;;  %v450_v60 = vmul.f32 %v441_v39, %v422_v23  ;;  %v451_v62 = vmul.f32 %v445_v40, %v422_v23 }
  0x92   : > { %v418_v29 = vpop.permute.xlu1 %417 }
  0x93   : > { %v368_v30 = vpop.permute.xlu0 %367  ;;  %v448_v46 = vmul.f32 %v441_v39, %v418_v29  ;;  %v449_v47 = vmul.f32 %v445_v40, %v418_v29 }
  0x94   : > { %v404_v43 = vmul.f32 %v399_v35, %v368_v30  ;;  %v405_v44 = vmul.f32 %v403_v36, %v368_v30 }
  0x96   : > { %v454_v54 = vadd.f32 %v446_v49, %v404_v43  ;;  %v455_v55 = vadd.f32 %v447_v50, %v405_v44 }
  0x97   : > { %v373_v37 = vpop.permute.xlu0 %372  ;;  %v383_v38 = vpop.permute.xlu1 %382 }
  0x98   : > { %v406_v41 = vmul.f32 %v399_v35, %v373_v37  ;;  %v407_v42 = vmul.f32 %v403_v36, %v373_v37  ;;  %v410_v10 = vmul.f32 %v399_v35, %v383_v38  ;;  %v411_v11 = vmul.f32 %v403_v36, %v383_v38  ;;  %v1056_v37 = vld [vmem:[%s1406_s3] sm:$0xff]   ;;  %v1057_v38 = vld [vmem:[%s1406_s3 + $0x8] sm:$0xff]  }
  0x9a   : > { %v456_v51 = vadd.f32 %v448_v46, %v406_v41  ;;  %v457_v52 = vadd.f32 %v449_v47, %v407_v42 }
  0x9b   : > { %v378_v45 = vpop.permute.xlu0 %377 }
  0x9c   : > { %v426_v48 = vpop.permute.xlu1 %425  ;;  %v408_v56 = vmul.f32 %v399_v35, %v378_v45  ;;  %v409_v57 = vmul.f32 %v403_v36, %v378_v45 }
  0x9d   : > { %v452_v2 = vmul.f32 %v441_v39, %v426_v48  ;;  %v453_v3 = vmul.f32 %v445_v40, %v426_v48  ;;  %v1127_v39 = vmov 839922192  }
  0x9e   : > { %v458_v8 = vadd.f32 %v450_v60, %v408_v56  ;;  %v459_v9 = vadd.f32 %v451_v62, %v409_v57  ;;  %v602_v40 = vunpack.c.l.s4 %v1127_v39 }
  0x9f   : > { %v474_v53 = vpop.permute.xlu0 %473  ;;  %v460_v19 = vadd.f32 %v452_v2, %v410_v10  ;;  %v461_v20 = vadd.f32 %v453_v3, %v411_v11 }
  0xa0   : > { %v488_v58 = vadd.f32 %v474_v53, %v456_v51  ;;  %v489_v59 = vadd.f32 %v474_v53, %v457_v52  ;;  %v603_v41 = vunpack.c.0.s8 %v602_v40 }
  0xa1   : > { %v469_v61 = vpop.permute.xlu1 %468 }
  0xa2   : > { %v497_v63 = vmul.f32 0.01, %v489_v59  ;;  %v486_v0 = vadd.f32 %v469_v61, %v454_v54  ;;  %v487_v1 = vadd.f32 %v469_v61, %v455_v55  ;;  %v496_v5 = vmul.f32 0.01, %v488_v58 }
  0xa3   : > { %v1313_v43 = vsub.s32 %v603_v41, %v1293_v21  ;;  %v599_v44 = vpop.permute.xlu0 %598 }
  0xa4   : > { %v494_v6 = vmul.f32 0.01, %v486_v0  ;;  %v495_v7 = vmul.f32 0.01, %v487_v1  ;;  %v505_v13 = vmax.f32 %v489_v59, %v497_v63  ;;  %v504_v18 = vmax.f32 %v488_v58, %v496_v5 }
  0xa5   : > { %v479_v12 = vpop.permute.xlu1 %478  ;;  %v607_v47 = vrot.slane %v599_v44, %v1313_v43 }
  0xa6   : > { %v490_v14 = vadd.f32 %v479_v12, %v458_v8  ;;  %v491_v15 = vadd.f32 %v479_v12, %v459_v9  ;;  %v503_v16 = vmax.f32 %v487_v1, %v495_v7  ;;  %v502_v17 = vmax.f32 %v486_v0, %v494_v6 }
  0xa7   : > { %v623_v56 = vpop.permute.xlu0 %622 }
  0xa8   : > { %v515_v22 = vpack.c.bf16 %v505_v13, %v503_v16  ;;  %v514_v24 = vpack.c.bf16 %v504_v18, %v502_v17  ;;  %v498_v25 = vmul.f32 0.01, %v490_v14  ;;  %v499_v26 = vmul.f32 0.01, %v491_v15  ;;  %v1058_v13 = vld [vmem:[%s1408_s5] sm:$0xff]  }
  0xa9   : > { %v484_v23 = vpop.permute.xlu1 %483  ;;  %v631_v61 = vrot.slane %v623_v56, %v1313_v43 }
  0xaa   : > { %v492_v27 = vadd.f32 %v484_v23, %v460_v19  ;;  %v493_v28 = vadd.f32 %v484_v23, %v461_v20  ;;  %535 = vmatprep.subr.bf16.mxu0 %v515_v22  ;;  %v506_v31 = vmax.f32 %v490_v14, %v498_v25  ;;  %v507_v32 = vmax.f32 %v491_v15, %v499_v26  ;;  %v1059_v14 = vld [vmem:[%s1408_s5 + $0x8] sm:$0xff]  }
  0xab   : > { %536 = vmatpush1.bf16.msra.mxu0 %v514_v24  ;;  %v752_v16 = vpop.permute.xlu0 %751 }
  0xac   : > { %v500_v29 = vmul.f32 0.01, %v492_v27  ;;  %v501_v30 = vmul.f32 0.01, %v493_v28  ;;  %v760_v19 = vrot.slane %v752_v16, %v1313_v43 }
  0xad   : > { %v611_v42 = vpop.permute.xlu1 %610 }
  0xae   : > { %v508_v33 = vmax.f32 %v492_v27, %v500_v29  ;;  %v509_v34 = vmax.f32 %v493_v28, %v501_v30  ;;  %v619_v45 = vrot.slane %v611_v42, %v1313_v43 }
  0xaf   : > { %v776_v28 = vpop.permute.xlu0 %775 }
  0xb0   : > { %v517_v35 = vpack.c.bf16 %v509_v34, %v507_v32  ;;  %v516_v36 = vpack.c.bf16 %v508_v33, %v506_v31  ;;  %v984_v50 = vcombine.low %v607_v47, %v619_v45  ;;  %v784_v34 = vrot.slane %v776_v28, %v1313_v43 }
  0xb1   : > { %v635_v53 = vpop.permute.xlu1 %634 }
  0xb2   : > { %537 = vmatprep.subr.bf16.mxu0 %v517_v35  ;;  %v643_v58 = vrot.slane %v635_v53, %v1313_v43 }
  0xb3   : > { %538 = vmatpush1.bf16.msra.mxu0 %v516_v36 }
  0xb4   : > { %v985_v1 = vcombine.low %v631_v61, %v643_v58 }
  0xb5   : > { %v764_v15 = vpop.permute.xlu1 %763 }
  0xb6   : > { %982 = vmatmul.mubr.msk.bf16.vlgmr.msra.gmra.mrb[0].mxu0 %vm528_vm0, %v1056_v37  ;;  %v772_v17 = vrot.slane %v764_v15, %v1313_v43 }
  0xb7   : > { %577 = vmatprep.mubr.bf16.mxu0 %v1126_v4 }
  0xb8   : > { %v990_v23 = vcombine.low %v760_v19, %v772_v17 }
  0xb9   : > { %v788_v26 = vpop.permute.xlu1 %787 }
  0xba   : > { %v796_v30 = vrot.slane %v788_v26, %v1313_v43  ;;  %v1060_v43 = vld [vmem:[%s1410_s7] sm:$0x1f]  }
  0xbe   : > { %983 = vmatmul.mubr.msk.bf16.gmra.mrb[4].mxu0 %vm528_vm0, %v1057_v38  ;;  %v991_v38 = vcombine.low %v784_v34, %v796_v30 }
  0xbf   : > { %875 = vmatprep.mubr.bf16.mxu0 %v1126_v4 }
 0x189   : > { %v569_v46 = vpop.f32.mrb[0].mxu0 }
 0x18a   : > { %v571_v48 = vpop.f32.mrb[1].mxu0 }
 0x18b   : > { %v573_v49 = vpop.f32.mrb[2].mxu0 }
 0x18c   : > { %v588_v51 = vpack.c.bf16 %v573_v49, %v569_v46  ;;  %v575_v52 = vpop.f32.mrb[3].mxu0 }
 0x18d   : > { %v589_v54 = vpack.c.bf16 %v575_v52, %v571_v48 }
 0x18e   : > { %v656_v55 = vadd.bf16 %v984_v50, %v588_v51 }
 0x18f   : > { %v657_v57 = vadd.bf16 %v984_v50, %v589_v54  ;;  %v828_v50 = vpop.permute.xlu0 %827  ;;  %v833_v54 = vpop.permute.xlu1 %832 }
 0x190   : > { %v660_v21 = vmul.bf16 1009007652, %v656_v55 }
 0x191   : > { %v579_v59 = vpop.f32.mrb[4].mxu0  ;;  %v661_v60 = vmul.bf16 1009007652, %v657_v57 }
 0x192   : > { %v581_v62 = vpop.f32.mrb[5].mxu0  ;;  %v664_v5 = vmax.bf16 %v660_v21, %v656_v55 }
 0x193   : > { %v583_v63 = vpop.f32.mrb[6].mxu0  ;;  %v665_v0 = vmax.bf16 %v661_v60, %v657_v57 }
 0x194   : > { %v590_v2 = vpack.c.bf16 %v583_v63, %v579_v59  ;;  %v585_v3 = vpop.f32.mrb[7].mxu0 }
 0x195   : > { %v591_v6 = vpack.c.bf16 %v585_v3, %v581_v62  ;;  %688 = vmatprep.subr.bf16.mxu1 %v665_v0 }
 0x196   : > { %v658_v7 = vadd.bf16 %v985_v1, %v590_v2  ;;  %689 = vmatpush1.bf16.msra.mxu1 %v664_v5 }
 0x197   : > { %v659_v8 = vadd.bf16 %v985_v1, %v591_v6 }
 0x198   : > { %v662_v9 = vmul.bf16 1009007652, %v658_v7 }
 0x199   : > { %v663_v10 = vmul.bf16 1009007652, %v659_v8 }
 0x19a   : > { %v666_v12 = vmax.bf16 %v662_v9, %v658_v7 }
 0x19b   : > { %v667_v11 = vmax.bf16 %v663_v10, %v659_v8 }
 0x19d   : > { %690 = vmatprep.subr.bf16.mxu1 %v667_v11 }
 0x19e   : > { %691 = vmatpush1.bf16.msra.mxu1 %v666_v12 }
 0x1a1   : > { %988 = vmatmul.mubr.msk.bf16.vlgmr.msra.gmra.mrb[0].mxu1 %vm528_vm0, %v1058_v13 }
 0x1a2   : > { %730 = vmatprep.mubr.bf16.mxu1 %v1126_v4 }
 0x1a9   : > { %989 = vmatmul.mubr.msk.bf16.gmra.mrb[4].mxu1 %vm528_vm0, %v1059_v14 }
 0x274   : > { %v722_v18 = vpop.f32.mrb[0].mxu1 }
 0x275   : > { %v724_v20 = vpop.f32.mrb[1].mxu1 }
 0x276   : > { %v726_v22 = vpop.f32.mrb[2].mxu1 }
 0x277   : > { %v741_v24 = vpack.c.bf16 %v726_v22, %v722_v18  ;;  %v728_v25 = vpop.f32.mrb[3].mxu1 }
 0x278   : > { %v742_v4 = vpack.c.bf16 %v728_v25, %v724_v20 }
 0x279   : > { %v809_v27 = vadd.bf16 %v990_v23, %v741_v24 }
 0x27a   : > { %v810_v29 = vadd.bf16 %v990_v23, %v742_v4 }
 0x27b   : > { %v813_v31 = vmul.bf16 1009007652, %v809_v27 }
 0x27c   : > { %v814_v32 = vmul.bf16 1009007652, %v810_v29  ;;  %v732_v33 = vpop.f32.mrb[4].mxu1 }
 0x27d   : > { %v734_v35 = vpop.f32.mrb[5].mxu1  ;;  %v817_v39 = vmax.bf16 %v813_v31, %v809_v27 }
 0x27e   : > { %v736_v36 = vpop.f32.mrb[6].mxu1  ;;  %v818_v37 = vmax.bf16 %v814_v32, %v810_v29 }
 0x27f   : > { %v743_v40 = vpack.c.bf16 %v736_v36, %v732_v33  ;;  %v738_v41 = vpop.f32.mrb[7].mxu1 }
 0x280   : > { %v744_v42 = vpack.c.bf16 %v738_v41, %v734_v35  ;;  %843 = vmatprep.subr.bf16.mxu0 %v818_v37 }
 0x281   : > { %v811_v44 = vadd.bf16 %v991_v38, %v743_v40  ;;  %844 = vmatpush1.bf16.msra.mxu0 %v817_v39 }
 0x282   : > { %v812_v45 = vadd.bf16 %v991_v38, %v744_v42 }
 0x283   : > { %v815_v46 = vmul.bf16 1009007652, %v811_v44 }
 0x284   : > { %v816_v47 = vmul.bf16 1009007652, %v812_v45 }
 0x285   : > { %v819_v49 = vmax.bf16 %v815_v46, %v811_v44 }
 0x286   : > { %v820_v48 = vmax.bf16 %v816_v47, %v812_v45 }
 0x288   : > { %845 = vmatprep.subr.bf16.mxu0 %v820_v48 }
 0x289   : > { %846 = vmatpush1.bf16.msra.mxu0 %v819_v49 }
 0x28c   : > { %993 = vmatmul.mubr.msk.bf16.vlgmr.msra.gmra.mrb[8].mxu0 %vm528_vm0, %v1060_v43 }
 0x35f   : > { %v877_v51 = vpop.f32.mrb[8].mxu0  ;;  %897 = sbr.rel (!%p1219_p5) target bundleno = 899 (0x383), region = 60 }
 0x360   : > { %v878_v52 = vadd.f32 %v877_v51, %v828_v50  ;;  %v879_v53 = vpop.f32.mrb[9].mxu0 }
 0x361   : > { %v880_v55 = vadd.f32 %v879_v53, %v828_v50  ;;  %v881_v56 = vpop.f32.mrb[10].mxu0 }
 0x362   : > { %886 = vst [vmem:[%s338_s28] sm:$0xff] %v878_v52  ;;  %v882_v57 = vadd.f32 %v881_v56, %v833_v54  ;;  %v883_v58 = vpop.f32.mrb[11].mxu0 }
 0x363   : > { %887 = vst [vmem:[%s338_s28 + $0x8] sm:$0xff] %v880_v55  ;;  %v884_v21 = vadd.f32 %v883_v58, %v833_v54 }
 0x364   : > { %888 = vst [vmem:[%s338_s28 + $0x10] sm:$0x3] %v882_v57 }
 0x365   : > { %889 = vst [vmem:[%s338_s28 + $0x18] sm:$0x3] %v884_v21 }
 0x366   : > { %s1420_s14 = smov (!%p900_p11, %s899_s14), 2 }
 0x367   : > { %s1345_s16 = sshll.u32 %s1420_s14, 8 }
 0x368   : > { %s904_s17 = ssub.s32 512, %s1345_s16 }
 0x369   : > { %905 = vsyncadd %s1337_s29, %s904_s17  ;;  %p997_p12 = scmp.ne.s32.totalorder %s1345_s16, 0  ;;  %s1004_s19 = sshll.u32 %s1202_s13, 8 }
 0x36a   : > { %s1354_s21 = scalar_lea.hbm %s1412_s9, %s1004_s19  ;;  %s999_s24 = sshll.u32 %s1420_s14, 3 }
 0x36b   : > { %s911_s25 = sshll.u32 %s338_s28, 4  ;;  %s1128_s27 = smov [#allocation2]   ;;  %s1357_s25 = int_to_ptr.vmem [resolvable:$true] %s911_s25 }
 0x36c   : > { %s1061_s26 = scalar_lea.vmem %s1357_s25, %s1345_s16  ;;  %s1065_s17 = sshll.u32 %s1128_s27, 4  ;;  %s1066_s17 = int_to_ptr.vmem [resolvable:$false] %s1065_s17 }
 0x36d   : > { %p1062_p13 = scmp.ne.s32.totalorder %s1357_s25, %s1061_s26  ;;  %s1067_s13 = scalar_lea.vmem %s1066_s17, 1024 }
 0x36e   : > { %p1068_p2 = scmp.lt.s32.totalorder %s1357_s25, %s1066_s17  ;;  %p1069_p3 = scmp.lt.s32.totalorder %s1067_s13, %s1061_s26 }
 0x36f   : > { %p1063_p0 = pnand %p1062_p13, %p997_p12 }
 0x370   : > { %p1070_p4 = por %p1069_p3, %p1068_p2 }
 0x371   : > { %p1064_p1 = pneg %p1063_p0 }
 0x373   : > { %p1071_p5 = pnand %p1070_p4, %p1064_p1 }
 0x375   : > { %1074 = shalt.err (!%p1071_p5)
}
 0x376   : > { %s1075_s28 = scalar_lea.hbm %s1354_s21, %s1345_s16  ;;  %s1079_s23 = scalar_lea.hbm %s1412_s9, 768 }
 0x377   : > { %p1076_p7 = scmp.ne.s32.totalorder %s1354_s21, %s1075_s28  ;;  %p1080_p10 = scmp.lt.u32.totalorder %s1354_s21, %s1412_s9 }
 0x378   : > { %p1081_p11 = scmp.lt.u32.totalorder %s1079_s23, %s1075_s28  ;;  %p1083_p0 = scmp.lt.u32.totalorder %s1075_s28, %s1354_s21 }
 0x379   : > { %p1077_p8 = pnand %p1076_p7, %p997_p12 }
 0x37a   : > { %p1082_p13 = por %p1081_p11, %p1080_p10 }
 0x37b   : > { %p1078_p9 = pneg %p1077_p8 }
 0x37c   : > { %p1084_p1 = por %p1083_p0, %p1082_p13 }
 0x37e   : > { %p1085_p2 = pnand %p1084_p1, %p1078_p9 }
 0x380   : > { %1088 = shalt.err (!%p1085_p2)
}
 0x381   : > { %s1129_s17 = smov 256   ;;  %s1130_s13 = smov 384  }
 0x382   : > { %917 = dma.vmem_to_hbm [thread:$0]  (%p997_p12), %s1357_s25, %s1345_s16, %s1354_s21, %s1337_s29, %s1129_s17, %s1130_s13, %s999_s24  }
 0x383 PF: > { %p1012_p3 = scmp.ge.s32.totalorder %s1123_s12, 2  ;;  %s926_s28 = sand.u32 1, %s1111_s30  }
 0x384   : > { %s927_s19 = scalar_lea.sflag [#allocation3], %s926_s28 }
 0x385   : > { %p1009_p4 = pnand %p1012_p3, %p1223_p6 }
 0x387   : > { %1106 = dma.done.wait (!%p1009_p4), %s927_s19, 512  }
 0x388   : > { %1108 = vsyncadd (!%p1009_p4), %s927_s19, 4294966784  ;;  %p19_p5 = scmp.ge.s32.totalorder %s1206_s15, 4   ;;  %s1415_s30 = smov %s1115_s10 }
 0x389   : > { %s1416_s10 = smov %s1119_s11  ;;  %s1417_s11 = smov %s1217_s18 }
 0x38a   : > { %s1418_s12 = smov %s1206_s15  ;;  %21 = sbr.rel (!%p19_p5) target bundleno = 3 (0x3), region = 91 }
 0x391   :  { %932 = vsyncpa [#allocation3], 1 }
 0x392   :  { %934 = vsyncpa [#allocation3 + $0x1], 1 }

</bundles_post_ra>
